<compile_context>
chip_gen: v7x
topology: tpu7x:2x2x1
jax: 0.10.0
libtpu: 0.0.40
codegen_flags: <defaults>
</compile_context>

<pallas_src>
import math

import jax
import jax.numpy as jnp
from jax.experimental import pallas as pl
from jax.experimental.pallas import tpu as pltpu


def _hbm_copy_kernel(x_ref, o_ref, sem):
    # Single direct HBM->HBM DMA.  No HBM->VMEM->vreg->VMEM->HBM round trip.
    cp = pltpu.make_async_copy(x_ref, o_ref, sem)
    cp.start()
    cp.wait()


def reshape3d(x, size):
    """Pallas equivalent of Reshape3d(size).forward(x)."""
    B = x.shape[0]
    s0, s1, s2 = size
    n = s0 * s1 * s2
    assert math.prod(x.shape[1:]) == n, "Reshape3d: element count mismatch"

    # NOTE: the optimal implementation is `return x.reshape(B, s0, s1, s2)`
    # (metadata-only, zero HBM traffic).  The pallas_call below exists only
    # because a kernel is required; it is the cheapest possible physical copy.

    itemsize = jnp.dtype(x.dtype).itemsize
    total = int(x.size)

    y = pl.pallas_call(
        _hbm_copy_kernel,
        out_shape=jax.ShapeDtypeStruct(x.shape, x.dtype),
        in_specs=[pl.BlockSpec(memory_space=pl.ANY)],
        out_specs=pl.BlockSpec(memory_space=pl.ANY),
        scratch_shapes=[pltpu.SemaphoreType.DMA(())],
        cost_estimate=pl.CostEstimate(
            flops=0, transcendentals=0, bytes_accessed=2 * total * itemsize
        ),
    )(x)

    # Row-major reinterpretation == torch .view element order (metadata-only).
    return y.reshape(B, s0, s1, s2)


if __name__ == "__main__":
    key = jax.random.PRNGKey(0)

    # Small shapes consistent with a conv-style NCHW input feeding Reshape3d.
    B, C, H, W = 2, 4, 16, 16          # 4*16*16 = 1024 elements per batch
    size = (16, 8, 8)                  # 16*8*8  = 1024 elements per batch

    x = jax.random.normal(key, (B, C, H, W), dtype=jnp.float32)

    reshape_fn = jax.jit(lambda a: reshape3d(a, size))

    y = reshape_fn(x)
    y = jax.block_until_ready(y)

    # Reference: torch .view == row-major reshape.
    y_ref = x.reshape(B, *size)
    assert y.shape == (B,) + tuple(size), y.shape
    assert y.dtype == x.dtype
    assert bool(jnp.array_equal(y, y_ref))

    print("KERNEL_OK")
</pallas_src>

<mosaic_0001>
module attributes {stable_mosaic.version = 11 : i64} {
  func.func @_hbm_copy_kernel(%arg0: memref<2x4x16x16xf32, #tpu.memory_space<any>>, %arg1: memref<2x4x16x16xf32, #tpu.memory_space<any>>, %arg2: memref<!tpu.dma_semaphore, #tpu.memory_space<semaphore_mem>>) attributes {dimension_semantics = [], scalar_prefetch = 0 : i64, scratch_operands = 1 : i64, tpu.core_type = #tpu.core_type<tc>} {
    tpu.enqueue_dma source(%arg0 : memref<2x4x16x16xf32, #tpu.memory_space<any>>) target(%arg1 : memref<2x4x16x16xf32, #tpu.memory_space<any>>) target_semaphore(%arg2 : memref<!tpu.dma_semaphore, #tpu.memory_space<semaphore_mem>>)
    tpu.wait_dma2 semaphore(%arg2 : memref<!tpu.dma_semaphore, #tpu.memory_space<semaphore_mem>>) src(%arg0 : memref<2x4x16x16xf32, #tpu.memory_space<any>>) dst(%arg1 : memref<2x4x16x16xf32, #tpu.memory_space<any>>)
    return
  }
}

</mosaic_0001>

<bundles_post_ra>
// kernel: _lambda_.1
= control target key start
LH: loop header
LB: loop body
LE: loop exit
PB: predicated region body
PF: predicated region fallthrough
CT: control target
= control target key end

     0   :  { %s78_s0 = inlined_call_operand.hbm [shape: f32[2,4,16,16], index: 0, kind: input, shape index: {}]   ;;  %s79_s1 = inlined_call_operand.vmem [shape: f32[2,4,16,16], index: 1, kind: output, shape index: {}]  }
   0x1   :  { %s13_s8 = sshll.u32 %s79_s1, 4  ;;  %s29_s11 = scalar_lea.hbm %s78_s0, 2048  ;;  %s14_s8 = int_to_ptr.vmem [resolvable:$true] %s13_s8 }
   0x2   :  { %p30_p0 = scmp.ne.s32.totalorder %s78_s0, %s29_s11  ;;  %p33_p1 = scmp.lt.u32.totalorder %s29_s11, %s78_s0 }
   0x4   :  { %p35_p2 = pnand %p33_p1, %p30_p0 }
   0x6   :  { %38 = shalt.err (!%p35_p2)  }
   0x7   :  { %s39_s16 = scalar_lea.vmem %s14_s8, 2048  ;;  %p44_p4 = scmp.lt.s32.totalorder %s14_s8, %s14_s8 }
   0x8   :  { %p40_p3 = scmp.ne.s32.totalorder %s14_s8, %s39_s16  ;;  %p45_p5 = scmp.lt.s32.totalorder %s39_s16, %s39_s16 }
   0xa   :  { %p46_p6 = por %p45_p5, %p44_p4 }
   0xc   :  { %p47_p7 = pnand %p46_p6, %p40_p3 }
   0xe   :  { %50 = shalt.err (!%p47_p7)  }
   0xf   :  { %16 = dma.hbm_to_vmem [thread:$0]  %s78_s0, 2048, %s14_s8, [#allocation2] }
  0x10   :  { %51 = dma.done.wait [#allocation2], 2048 }
  0x11   :  { %52 = vsyncadd [#allocation2], 4294965248 }
  0x12   :  { %22 = vsyncmov [#allocation2] }
  0x15   :  { %s23_s18 = vpop.sfrf %22 }
  0x16   :  { %p28_p8 = scmp.ne.s32.totalorder %s23_s18, 0 }
  0x18   :  { %27 = shalt.err (%p28_p8)  }

</bundles_post_ra>
